<compile_context>
chip_gen: v7x
topology: tpu7x:2x2x1
jax: 0.10.0
libtpu: 0.0.40
codegen_flags: <defaults>
</compile_context>

<pallas_src>
import functools

import numpy as np
import jax
import jax.numpy as jnp
from jax import lax
from jax.experimental import pallas as pl
from jax.experimental.pallas import tpu as pltpu


def _round_up(x, m):
    return -(-x // m) * m


def _build_synthesis_matrix(nbands, framesize, n_chunks, k_padded, n_cols_padded, dtype):
    """Band-major folded synthesis matrix.

    W2[b*framesize + j, k] = Wfir[b, k - j] for 0 <= k - j < N (else 0), where
    Wfir folds irfft + roll(nbands-1) + periodic hann, so that

        filtered[m, k] = sum_{b,j} H[m, b] * noise[m, j] * W2[b*framesize + j, k]

    reproduces conv_full(noise[m], firwin[m]) chunked as k = c*framesize + r.
    Rows are zero-padded to k_padded and columns to n_cols_padded (lane-aligned
    contraction dim, lane-dense kernel output).
    """
    N = 2 * nbands - 1
    m = np.arange(N)
    b = np.arange(nbands)
    # real irfft of a real (zero-phase) half-spectrum:
    #   x[m] = (1/N) * (H[0] + 2 * sum_k H[k] * cos(2*pi*k*m/N))
    coef = np.where(b == 0, 1.0, 2.0) / N
    # torch.hann_window(N) default is periodic: w[n] = 0.5 - 0.5*cos(2*pi*n/N)
    hann = 0.5 - 0.5 * np.cos(2.0 * np.pi * m / N)
    # roll by (nbands-1) folded into the cosine argument, then windowed.
    Wfir = (coef[:, None]
            * np.cos(2.0 * np.pi * b[:, None] * (m[None, :] - (nbands - 1)) / N)
            * hann[None, :])                                   # [nbands, N]
    L_pad = n_chunks * framesize
    j = np.arange(framesize)
    k = np.arange(L_pad)
    idx = k[None, :] - j[:, None]                              # [framesize, L_pad]
    valid = (idx >= 0) & (idx < N)
    idxc = np.clip(idx, 0, N - 1)
    # band-major row order: rows indexed by (b, j)
    Wshift = Wfir[:, idxc] * valid[None, :, :]                 # [nbands, framesize, L_pad]
    W2 = Wshift.reshape(nbands * framesize, L_pad)
    W2 = np.pad(W2, ((0, k_padded - nbands * framesize),
                     (0, n_cols_padded - L_pad)))
    return jnp.asarray(W2, dtype=dtype)                        # [k_padded, n_cols_padded]


def _fng_kernel(h_ref, n_ref, w_ref, out_ref, x_ref, *, nbands, framesize):
    # h_ref:   [tm, nbands]        rows = flattened (batch, frame)
    # n_ref:   [tm, framesize]     noise
    # w_ref:   [Kp, tn]            folded band-major synthesis matrix (resident)
    # out_ref: [tm, tn]            lane-dense filtered frames (padded full conv)
    # x_ref:   [tm, Kp]            VMEM scratch: fused-contraction LHS
    K = nbands * framesize
    n = n_ref[...]
    if nbands <= 64:
        # Small band count: fully unrolled, all-static lane-dense stores.
        h = h_ref[...]
        for b in range(nbands):
            x_ref[:, b * framesize:(b + 1) * framesize] = n * h[:, b:b + 1]
    else:
        # Large band count: bound code size; ref-side dynamic slice (VMEM load,
        # no per-iteration cross-lane extraction from a vreg-resident array).
        def band_body(b, carry):
            start = pl.multiple_of(b * framesize, framesize)
            x_ref[:, pl.ds(start, framesize)] = n * h_ref[:, pl.ds(b, 1)]
            return carry
        lax.fori_loop(0, nbands, band_body, 0, unroll=2)
    if x_ref.shape[1] > K:
        # Zero the K-padding columns (W2's pad rows are zero, but stale VMEM
        # could hold NaN/Inf and 0*NaN = NaN).
        x_ref[:, K:] = jnp.zeros((x_ref.shape[0], x_ref.shape[1] - K), x_ref.dtype)
    # Single MXU contraction over the fused (band, tap) axis; f32 accumulation.
    out_ref[...] = jnp.dot(x_ref[...], w_ref[...],
                           preferred_element_type=jnp.float32)


def filtered_noise_generator(H, noise, framesize, compute_dtype=jnp.float32):
    """H: [B, t, nbands] real half-spectrum; noise: [B, t, framesize] in [-1, 1).
    Returns [B, t * framesize] (matches the PyTorch module's forward).
    compute_dtype=jnp.bfloat16 halves VMEM and uses the native MXU dtype
    (keep f32 for tight-tolerance checks)."""
    B, t, nbands = H.shape
    N = 2 * nbands - 1
    L = framesize + N - 1                       # full-conv length per frame
    n_chunks = -(-L // framesize)
    L_pad = n_chunks * framesize
    K = framesize * nbands
    Kp = _round_up(K, 128)                      # lane-aligned contraction dim
    M = B * t
    itemsize = jnp.dtype(compute_dtype).itemsize

    # --- tile / grid selection -------------------------------------------------
    if M <= 256:
        tm = _round_up(M, 8)                    # one full tile, single grid step
    else:
        tm = 256                                # fills v6e/v7x 256-wide MXU rows
        # back off if the X scratch + resident W2 would not fit a v7x-safe budget
        while tm > 128 and (Kp * _round_up(L_pad, 128) + tm * Kp) * itemsize > 40 * 1024 * 1024:
            tm //= 2
    Mp = _round_up(M, tm)
    m_tiles = Mp // tm

    # If all rows fit one tile but the output is wide, split the output columns
    # in two so dimension_semantics="parallel" can feed both v7x TensorCores.
    if m_tiles == 1 and L_pad > 128:
        Np = _round_up(L_pad, 256)
        col_tiles = 2
    else:
        Np = _round_up(L_pad, 128)
        col_tiles = 1
    tn = Np // col_tiles

    W2 = _build_synthesis_matrix(nbands, framesize, n_chunks, Kp, Np, compute_dtype)
    H2 = H.reshape(M, nbands).astype(compute_dtype)
    N2 = noise.reshape(M, framesize).astype(compute_dtype)
    if Mp != M:
        H2 = jnp.pad(H2, ((0, Mp - M), (0, 0)))
        N2 = jnp.pad(N2, ((0, Mp - M), (0, 0)))

    # Resident constant W2: at production sizes (>= 8 MiB) single-buffer it —
    # a constant index_map never re-fetches, and double-buffering a ~34 MB f32
    # matrix alone would blow v7x's 64 MiB VMEM.  The small/toy path keeps the
    # default pipeline mode.
    w2_bytes = Kp * Np * itemsize
    if col_tiles == 1 and w2_bytes >= 8 * 1024 * 1024:
        w_spec = pl.BlockSpec((Kp, tn), lambda i, j: (0, j),
                              pipeline_mode=pl.Buffered(1))
        w2_buffers = 1
    else:
        w_spec = pl.BlockSpec((Kp, tn), lambda i, j: (0, j))
        w2_buffers = 2

    vmem_est = (Kp * tn * itemsize * w2_buffers       # W2 tile(s)
                + tm * Kp * itemsize                  # X scratch
                + 2 * tm * tn * 4                     # double-buffered f32 out tile
                + 2 * tm * (nbands + framesize) * itemsize)
    vmem_limit = int(min(max(vmem_est * 5 // 4 + (4 << 20), 32 << 20), 56 << 20))

    kernel = functools.partial(_fng_kernel, nbands=nbands, framesize=framesize)
    filtered = pl.pallas_call(
        kernel,
        out_shape=jax.ShapeDtypeStruct((Mp, Np), jnp.float32),
        grid=(m_tiles, col_tiles),
        in_specs=[
            pl.BlockSpec((tm, nbands), lambda i, j: (i, 0)),
            pl.BlockSpec((tm, framesize), lambda i, j: (i, 0)),
            w_spec,
        ],
        out_specs=pl.BlockSpec((tm, tn), lambda i, j: (i, j)),
        scratch_shapes=[pltpu.VMEM((tm, Kp), compute_dtype)],
        compiler_params=pltpu.CompilerParams(
            dimension_semantics=("parallel", "parallel"),
            vmem_limit_bytes=vmem_limit,
        ),
    )(H2, N2, W2)

    # Overlap-add on the lane-dense result: frame i's chunk c lands at row i + c.
    fil = filtered[:M, :L_pad].reshape(B, t, n_chunks, framesize)
    out_rows = t + n_chunks - 1
    buf = jnp.zeros((B, out_rows, framesize), jnp.float32)
    for c in range(n_chunks):                            # n_chunks is 2-3
        buf = buf.at[:, c:c + t, :].add(fil[:, :, c, :])
    out_flat = buf.reshape(B, out_rows * framesize)
    # trim nbands-1 samples from each side -> [B, t*framesize]
    return out_flat[:, nbands - 1: nbands - 1 + t * framesize]


def _reference_numpy(H, noise, framesize):
    """Pure numpy reference mirroring the PyTorch forward (same noise passed in)."""
    B, t, nbands = H.shape
    N = 2 * nbands - 1
    zero_phase = np.fft.irfft(H, n=N, axis=-1)
    lin_phase = np.roll(zero_phase, nbands - 1, axis=-1)
    hann = 0.5 - 0.5 * np.cos(2.0 * np.pi * np.arange(N) / N)
    firwin = lin_phase * hann
    L = framesize + N - 1
    conv = np.zeros((B, t, L), dtype=np.float64)
    for bb in range(B):
        for i in range(t):
            conv[bb, i] = np.convolve(noise[bb, i], firwin[bb, i], mode="full")
    OL = (t - 1) * framesize + L
    out = np.zeros((B, OL), dtype=np.float64)
    for i in range(t):
        out[:, i * framesize:i * framesize + L] += conv[:, i]
    return out[:, nbands - 1: OL - (nbands - 1)]


if __name__ == "__main__":
    B, t, nbands, framesize = 2, 8, 9, 16
    key = jax.random.PRNGKey(0)
    kH, kN = jax.random.split(key)
    H = jax.random.uniform(kH, (B, t, nbands), dtype=jnp.float32)
    # torch.rand(...) * 2 - 1  ->  uniform noise in [-1, 1); generated deterministically here.
    noise = jax.random.uniform(kN, (B, t, framesize), dtype=jnp.float32) * 2.0 - 1.0

    out = filtered_noise_generator(H, noise, framesize)
    out = jax.block_until_ready(out)
    assert out.shape == (B, t * framesize), out.shape

    ref = _reference_numpy(np.asarray(H, dtype=np.float64),
                           np.asarray(noise, dtype=np.float64), framesize)
    if not np.allclose(np.asarray(out), ref, rtol=1e-4, atol=1e-4):
        raise AssertionError("Pallas kernel output mismatch vs numpy reference")
    print("KERNEL_OK")
</pallas_src>

<mosaic_0001>
module attributes {stable_mosaic.version = 11 : i64} {
  func.func @_fng_kernel(%arg0: i32, %arg1: i32, %arg2: memref<16x9xf32, #tpu.memory_space<vmem>>, %arg3: memref<16x16xf32, #tpu.memory_space<vmem>>, %arg4: memref<256x128xf32, #tpu.memory_space<vmem>>, %arg5: memref<16x128xf32, #tpu.memory_space<vmem>>, %arg6: memref<16x256xf32, #tpu.memory_space<vmem>>) attributes {dimension_semantics = [#tpu.dimension_semantics<parallel>, #tpu.dimension_semantics<parallel>], iteration_bounds = array<i64: 1, 1>, scalar_prefetch = 0 : i64, scratch_operands = 1 : i64, tpu.core_type = #tpu.core_type<tc>, window_params = [{transform_indices = @transform_0, window_bounds = array<i64: 16, 9>}, {transform_indices = @transform_1, window_bounds = array<i64: 16, 16>}, {transform_indices = @transform_2, window_bounds = array<i64: 256, 128>}, {transform_indices = @transform_3, window_bounds = array<i64: 16, 128>}]} {
    %c0 = arith.constant 0 : index
    %c0_0 = arith.constant 0 : index
    %0 = vector.load %arg3[%c0, %c0_0] : memref<16x16xf32, #tpu.memory_space<vmem>>, vector<16x16xf32>
    %c0_1 = arith.constant 0 : index
    %c0_2 = arith.constant 0 : index
    %1 = vector.load %arg2[%c0_1, %c0_2] : memref<16x9xf32, #tpu.memory_space<vmem>>, vector<16x9xf32>
    %2 = vector.extract_strided_slice %1 {offsets = [0, 0], sizes = [16, 1], strides = [1, 1]} : vector<16x9xf32> to vector<16x1xf32>
    %3 = vector.broadcast %2 : vector<16x1xf32> to vector<16x16xf32>
    %4 = arith.mulf %0, %3 : vector<16x16xf32>
    %c0_3 = arith.constant 0 : index
    %c0_4 = arith.constant 0 : index
    %5 = vector.load %arg6[%c0_3, %c0_4] : memref<16x256xf32, #tpu.memory_space<vmem>>, vector<16x16xf32>
    tpu.vector_store %arg6[%c0_3, %c0_4], %4 {strides = array<i32>} : memref<16x256xf32, #tpu.memory_space<vmem>>, vector<16x16xf32>,
    %6 = vector.extract_strided_slice %1 {offsets = [0, 1], sizes = [16, 1], strides = [1, 1]} : vector<16x9xf32> to vector<16x1xf32>
    %7 = vector.broadcast %6 : vector<16x1xf32> to vector<16x16xf32>
    %8 = arith.mulf %0, %7 : vector<16x16xf32>
    %c0_5 = arith.constant 0 : index
    %c16 = arith.constant 16 : index
    %9 = vector.load %arg6[%c0_5, %c16] : memref<16x256xf32, #tpu.memory_space<vmem>>, vector<16x16xf32>
    tpu.vector_store %arg6[%c0_5, %c16], %8 {strides = array<i32>} : memref<16x256xf32, #tpu.memory_space<vmem>>, vector<16x16xf32>,
    %10 = vector.extract_strided_slice %1 {offsets = [0, 2], sizes = [16, 1], strides = [1, 1]} : vector<16x9xf32> to vector<16x1xf32>
    %11 = vector.broadcast %10 : vector<16x1xf32> to vector<16x16xf32>
    %12 = arith.mulf %0, %11 : vector<16x16xf32>
    %c0_6 = arith.constant 0 : index
    %c32 = arith.constant 32 : index
    %13 = vector.load %arg6[%c0_6, %c32] : memref<16x256xf32, #tpu.memory_space<vmem>>, vector<16x16xf32>
    tpu.vector_store %arg6[%c0_6, %c32], %12 {strides = array<i32>} : memref<16x256xf32, #tpu.memory_space<vmem>>, vector<16x16xf32>,
    %14 = vector.extract_strided_slice %1 {offsets = [0, 3], sizes = [16, 1], strides = [1, 1]} : vector<16x9xf32> to vector<16x1xf32>
    %15 = vector.broadcast %14 : vector<16x1xf32> to vector<16x16xf32>
    %16 = arith.mulf %0, %15 : vector<16x16xf32>
    %c0_7 = arith.constant 0 : index
    %c48 = arith.constant 48 : index
    %17 = vector.load %arg6[%c0_7, %c48] : memref<16x256xf32, #tpu.memory_space<vmem>>, vector<16x16xf32>
    tpu.vector_store %arg6[%c0_7, %c48], %16 {strides = array<i32>} : memref<16x256xf32, #tpu.memory_space<vmem>>, vector<16x16xf32>,
    %18 = vector.extract_strided_slice %1 {offsets = [0, 4], sizes = [16, 1], strides = [1, 1]} : vector<16x9xf32> to vector<16x1xf32>
    %19 = vector.broadcast %18 : vector<16x1xf32> to vector<16x16xf32>
    %20 = arith.mulf %0, %19 : vector<16x16xf32>
    %c0_8 = arith.constant 0 : index
    %c64 = arith.constant 64 : index
    %21 = vector.load %arg6[%c0_8, %c64] : memref<16x256xf32, #tpu.memory_space<vmem>>, vector<16x16xf32>
    tpu.vector_store %arg6[%c0_8, %c64], %20 {strides = array<i32>} : memref<16x256xf32, #tpu.memory_space<vmem>>, vector<16x16xf32>,
    %22 = vector.extract_strided_slice %1 {offsets = [0, 5], sizes = [16, 1], strides = [1, 1]} : vector<16x9xf32> to vector<16x1xf32>
    %23 = vector.broadcast %22 : vector<16x1xf32> to vector<16x16xf32>
    %24 = arith.mulf %0, %23 : vector<16x16xf32>
    %c0_9 = arith.constant 0 : index
    %c80 = arith.constant 80 : index
    %25 = vector.load %arg6[%c0_9, %c80] : memref<16x256xf32, #tpu.memory_space<vmem>>, vector<16x16xf32>
    tpu.vector_store %arg6[%c0_9, %c80], %24 {strides = array<i32>} : memref<16x256xf32, #tpu.memory_space<vmem>>, vector<16x16xf32>,
    %26 = vector.extract_strided_slice %1 {offsets = [0, 6], sizes = [16, 1], strides = [1, 1]} : vector<16x9xf32> to vector<16x1xf32>
    %27 = vector.broadcast %26 : vector<16x1xf32> to vector<16x16xf32>
    %28 = arith.mulf %0, %27 : vector<16x16xf32>
    %c0_10 = arith.constant 0 : index
    %c96 = arith.constant 96 : index
    %29 = vector.load %arg6[%c0_10, %c96] : memref<16x256xf32, #tpu.memory_space<vmem>>, vector<16x16xf32>
    tpu.vector_store %arg6[%c0_10, %c96], %28 {strides = array<i32>} : memref<16x256xf32, #tpu.memory_space<vmem>>, vector<16x16xf32>,
    %30 = vector.extract_strided_slice %1 {offsets = [0, 7], sizes = [16, 1], strides = [1, 1]} : vector<16x9xf32> to vector<16x1xf32>
    %31 = vector.broadcast %30 : vector<16x1xf32> to vector<16x16xf32>
    %32 = arith.mulf %0, %31 : vector<16x16xf32>
    %c0_11 = arith.constant 0 : index
    %c112 = arith.constant 112 : index
    %33 = vector.load %arg6[%c0_11, %c112] : memref<16x256xf32, #tpu.memory_space<vmem>>, vector<16x16xf32>
    tpu.vector_store %arg6[%c0_11, %c112], %32 {strides = array<i32>} : memref<16x256xf32, #tpu.memory_space<vmem>>, vector<16x16xf32>,
    %34 = vector.extract_strided_slice %1 {offsets = [0, 8], sizes = [16, 1], strides = [1, 1]} : vector<16x9xf32> to vector<16x1xf32>
    %35 = vector.broadcast %34 : vector<16x1xf32> to vector<16x16xf32>
    %36 = arith.mulf %0, %35 : vector<16x16xf32>
    %c0_12 = arith.constant 0 : index
    %c128 = arith.constant 128 : index
    %37 = vector.load %arg6[%c0_12, %c128] : memref<16x256xf32, #tpu.memory_space<vmem>>, vector<16x16xf32>
    tpu.vector_store %arg6[%c0_12, %c128], %36 {strides = array<i32>} : memref<16x256xf32, #tpu.memory_space<vmem>>, vector<16x16xf32>,
    %cst = arith.constant 0.000000e+00 : f32
    %38 = vector.broadcast %cst : f32 to vector<16x112xf32>
    %c0_13 = arith.constant 0 : index
    %c144 = arith.constant 144 : index
    %39 = vector.load %arg6[%c0_13, %c144] : memref<16x256xf32, #tpu.memory_space<vmem>>, vector<16x112xf32>
    tpu.vector_store %arg6[%c0_13, %c144], %38 {strides = array<i32>} : memref<16x256xf32, #tpu.memory_space<vmem>>, vector<16x112xf32>,
    %c0_14 = arith.constant 0 : index
    %c0_15 = arith.constant 0 : index
    %40 = vector.load %arg6[%c0_14, %c0_15] : memref<16x256xf32, #tpu.memory_space<vmem>>, vector<16x256xf32>
    %c0_16 = arith.constant 0 : index
    %c0_17 = arith.constant 0 : index
    %41 = vector.load %arg4[%c0_16, %c0_17] : memref<256x128xf32, #tpu.memory_space<vmem>>, vector<256x128xf32>
    %cst_18 = arith.constant dense<0.000000e+00> : vector<16x128xf32>
    %42 = tpu.matmul %40, %41, %cst_18 {dimension_numbers = #tpu.dot_dimension_numbers<[1], [0], [0], [1], [0, 0, 1, 1], [], []>} : vector<16x256xf32>, vector<256x128xf32>, vector<16x128xf32> -> vector<16x128xf32>
    %c0_19 = arith.constant 0 : index
    %c0_20 = arith.constant 0 : index
    %43 = vector.load %arg5[%c0_19, %c0_20] : memref<16x128xf32, #tpu.memory_space<vmem>>, vector<16x128xf32>
    tpu.vector_store %arg5[%c0_19, %c0_20], %42 {strides = array<i32>} : memref<16x128xf32, #tpu.memory_space<vmem>>, vector<16x128xf32>,
    return
  }
  func.func @transform_0(%arg0: i32, %arg1: i32) -> (i32, i32) {
    %c0_i32 = arith.constant 0 : i32
    %c0_i32_0 = arith.constant 0 : i32
    return %arg0, %c0_i32 : i32, i32
  }
  func.func @transform_1(%arg0: i32, %arg1: i32) -> (i32, i32) {
    %c0_i32 = arith.constant 0 : i32
    %c0_i32_0 = arith.constant 0 : i32
    return %arg0, %c0_i32 : i32, i32
  }
  func.func @transform_2(%arg0: i32, %arg1: i32) -> (i32, i32) {
    %c0_i32 = arith.constant 0 : i32
    %c0_i32_0 = arith.constant 0 : i32
    return %c0_i32, %arg1 : i32, i32
  }
  func.func @transform_3(%arg0: i32, %arg1: i32) -> (i32, i32) {
    %c0_i32 = arith.constant 0 : i32
    return %arg0, %arg1 : i32, i32
  }
}

</mosaic_0001>

<bundles_post_ra>
// kernel: tpu_custom_call.1
= control target key start
LH: loop header
LB: loop body
LE: loop exit
PB: predicated region body
PF: predicated region fallthrough
CT: control target
= control target key end

     0   :  { %8 = vsyncpa [#allocation4], 0  ;;  %s723_s0 = inlined_call_operand.hbm [shape: f32[16,9], index: 0, kind: input, shape index: {}]   ;;  %s724_s1 = inlined_call_operand.hbm [shape: f32[16,16], index: 1, kind: input, shape index: {}]   ;;  %s725_s2 = inlined_call_operand.hbm [shape: f32[256,128], index: 2, kind: input, shape index: {}]   ;;  %s726_s3 = inlined_call_operand.hbm [shape: f32[16,128], index: 3, kind: output, shape index: {}]  }
   0x1   :  { %9 = vsyncpa [#allocation7], 0 }
   0x2   :  { %10 = vsyncpa [#allocation5], 0  ;;  %s585_s12 = smov [#allocation6]   ;;  %s586_s14 = smov [#allocation3]  }
   0x3   :  { %s28_s13 = sshll.u32 %s585_s12, 4  ;;  %s16_s15 = sshll.u32 %s586_s14, 4  ;;  %s29_s13 = int_to_ptr.vmem [resolvable:$true] %s28_s13  ;;  %s628_s15 = int_to_ptr.vmem [resolvable:$true] %s16_s15 }
   0x4   :  { %s491_s18 = scalar_lea.hbm %s724_s1, 256 }
   0x5   :  { %p492_p0 = scmp.ne.s32.totalorder %s724_s1, %s491_s18  ;;  %p495_p1 = scmp.lt.u32.totalorder %s491_s18, %s724_s1 }
   0x7   :  { %p497_p2 = pnand %p495_p1, %p492_p0 }
   0x9   :  { %500 = shalt.err (!%p497_p2)
}
   0xa   :  { %s501_s23 = scalar_lea.vmem %s29_s13, 256  ;;  %p506_p4 = scmp.lt.s32.totalorder %s29_s13, %s29_s13 }
   0xb   :  { %p502_p3 = scmp.ne.s32.totalorder %s29_s13, %s501_s23  ;;  %p507_p5 = scmp.lt.s32.totalorder %s501_s23, %s501_s23 }
   0xd   :  { %p508_p6 = por %p507_p5, %p506_p4 }
   0xf   :  { %p509_p7 = pnand %p508_p6, %p502_p3 }
  0x11   :  { %512 = shalt.err (!%p509_p7)
}
  0x12   :  { %s587_s24 = smov 128   ;;  %s588_s25 = smov 8  }
  0x13   :  { %34 = dma.hbm_to_vmem [thread:$0]  %s724_s1, 256, %s29_s13, [#allocation7], %s587_s24, %s587_s24, %s588_s25  }
  0x14   :  { %s513_s30 = scalar_lea.hbm %s723_s0, 256 }
  0x15   :  { %p514_p8 = scmp.ne.s32.totalorder %s723_s0, %s513_s30  ;;  %p517_p9 = scmp.lt.u32.totalorder %s513_s30, %s723_s0 }
  0x17   :  { %p519_p10 = pnand %p517_p9, %p514_p8 }
  0x19   :  { %522 = shalt.err (!%p519_p10)
}
  0x1a   :  { %s523_s8 = scalar_lea.vmem %s628_s15, 256  ;;  %p528_p12 = scmp.lt.s32.totalorder %s628_s15, %s628_s15 }
  0x1b   :  { %p524_p11 = scmp.ne.s32.totalorder %s628_s15, %s523_s8  ;;  %p529_p13 = scmp.lt.s32.totalorder %s523_s8, %s523_s8 }
  0x1d   :  { %p530_p0 = por %p529_p13, %p528_p12 }
  0x1f   :  { %p531_p1 = pnand %p530_p0, %p524_p11 }
  0x21   :  { %534 = shalt.err (!%p531_p1)
}
  0x22   :  { %22 = dma.hbm_to_vmem [thread:$0]  %s723_s0, 256, %s628_s15, [#allocation4], %s587_s24, %s587_s24, %s588_s25  }
  0x23   :  { %s589_s10 = smov [#allocation8]   ;;  %s535_s14 = scalar_lea.hbm %s725_s2, 4096 }
  0x24   :  { %s40_s11 = sshll.u32 %s589_s10, 4  ;;  %p536_p2 = scmp.ne.s32.totalorder %s725_s2, %s535_s14  ;;  %s41_s11 = int_to_ptr.vmem [resolvable:$true] %s40_s11 }
  0x25   :  { %p539_p3 = scmp.lt.u32.totalorder %s535_s14, %s725_s2 }
  0x27   :  { %p541_p4 = pnand %p539_p3, %p536_p2 }
  0x29   :  { %544 = shalt.err (!%p541_p4)
}
  0x2a   :  { %s545_s20 = scalar_lea.vmem %s41_s11, 4096  ;;  %p550_p6 = scmp.lt.s32.totalorder %s41_s11, %s41_s11 }
  0x2b   :  { %p546_p5 = scmp.ne.s32.totalorder %s41_s11, %s545_s20  ;;  %p551_p7 = scmp.lt.s32.totalorder %s545_s20, %s545_s20 }
  0x2d   :  { %p552_p8 = por %p551_p7, %p550_p6 }
  0x2f   :  { %p553_p9 = pnand %p552_p8, %p546_p5 }
  0x31   :  { %556 = shalt.err (!%p553_p9)
}
  0x32   :  { %46 = dma.hbm_to_vmem [thread:$0]  %s725_s2, 4096, %s41_s11, [#allocation7], %s587_s24, %s587_s24, %s588_s25  }
  0x33   :  { %579 = dma.done.wait [#allocation4], 256  }
  0x34   :  { %580 = vsyncadd [#allocation4], 4294967040 }
  0x35   :  { %581 = dma.done.wait [#allocation7], 4352  }
  0x36   :  { %582 = vsyncadd [#allocation7], 4294962944  ;;  %v590_v0 = vmov 2   ;;  %v591_v1 = vmov 1   ;;  %v58_v2 = vld [vmem:[#allocation3] sm:$0xff]  ;;  %v59_v3 = vld [vmem:[#allocation3 + $0x8] sm:$0xff] }
  0x37   :  { %478 = vset.pattern.permute.xlu1 %v590_v0  ;;  %477 = vset.pattern.permute.xlu0 %v591_v1  ;;  %v592_v4 = vmov 3   ;;  %v593_v5 = vmov 4   ;;  %v594_v6 = vmov 5   ;;  %v595_v7 = vmov 6   ;;  %v257_v11 = vld [vmem:[#allocation8 + $0x80] sm:$0xff]  ;;  %v258_v12 = vld [vmem:[#allocation8 + $0x88] sm:$0xff] }
  0x38   :  { %97 = vperm.xlu1 %478, %v58_v2   ;;  %76 = vperm.xlu0 %477, %v58_v2   ;;  %v596_v8 = vmov 7   ;;  %v597_v9 = vmov 8   ;;  %v598_v10 = vmov 0   ;;  %v406_v13 = vpack.c.bf16 %v258_v12, %v257_v11  ;;  %v241_v14 = vld [vmem:[#allocation8] sm:$0xff]  ;;  %v242_v15 = vld [vmem:[#allocation8 + $0x8] sm:$0xff]  ;;  %v680_v17 = vld [vmem:[#allocation6] sm:$0xff] }
  0x39   :  { %v408_v16 = vpack.c.bf16 %v242_v15, %v241_v14  ;;  %v259_v18 = vld [vmem:[#allocation8 + $0x90] sm:$0xff]  ;;  %v260_v19 = vld [vmem:[#allocation8 + $0x98] sm:$0xff]  ;;  %s599_s2 = smov 16   ;;  %v261_v28 = vld [vmem:[#allocation8 + $0xa0] sm:$0xff]  ;;  %s600_s21 = smov 32   ;;  %vm234_vm0 = vcmask 1047680  }
  0x3a   :  { %438 = vmatprep.subr.bf16.mxu1 %v406_v13  ;;  %407 = vmatprep.subr.bf16.mxu0 %v406_v13  ;;  %v410_v22 = vpack.c.bf16 %v260_v19, %v259_v18  ;;  %v243_v23 = vld [vmem:[#allocation8 + $0x10] sm:$0xff]  ;;  %v244_v24 = vld [vmem:[#allocation8 + $0x18] sm:$0xff]  ;;  %v262_v29 = vld [vmem:[#allocation8 + $0xa8] sm:$0xff]  ;;  %s601_s22 = smov 48   ;;  %s602_s23 = smov 64   ;;  %vm72_vm1 = vcmask 130048  }
  0x3b   :  { %446 = vmatpush3.bf16.msra.mxu1 %v408_v16  ;;  %409 = vmatpush3.bf16.msra.mxu0 %v408_v16  ;;  %v412_v26 = vpack.c.bf16 %v244_v24, %v243_v23  ;;  %v683_v27 = vld [vmem:[#allocation6 + $0x8] sm:$0xff]  ;;  %v414_v32 = vpack.c.bf16 %v262_v29, %v261_v28  ;;  %v245_v33 = vld [vmem:[#allocation8 + $0x20] sm:$0xff]  ;;  %v246_v34 = vld [vmem:[#allocation8 + $0x28] sm:$0xff]  ;;  %s603_s26 = smov 80   ;;  %s604_s27 = smov 96   ;;  %v605_v28 = vmov 0.0  }
  0x3c   :  { %101 = vperm.xlu1 %478, %v59_v3   ;;  %80 = vperm.xlu0 %477, %v59_v3   ;;  %v416_v37 = vpack.c.bf16 %v246_v34, %v245_v33  ;;  %v263_v38 = vld [vmem:[#allocation8 + $0xb0] sm:$0xff]  ;;  %v264_v39 = vld [vmem:[#allocation8 + $0xb8] sm:$0xff]  ;;  %v265_v48 = vld [vmem:[#allocation8 + $0xc0] sm:$0xff]  ;;  %s606_s28 = smov 112   ;;  %vm93_vm2 = vcmask 261248   ;;  %vm114_vm3 = vcmask 392448  }
  0x3d   :  { %439 = vmatprep.subr.bf16.mxu1 %v410_v22  ;;  %411 = vmatprep.subr.bf16.mxu0 %v410_v22  ;;  %v418_v40 = vpack.c.bf16 %v264_v39, %v263_v38  ;;  %v247_v41 = vld [vmem:[#allocation8 + $0x30] sm:$0xff]  ;;  %v248_v42 = vld [vmem:[#allocation8 + $0x38] sm:$0xff]  ;;  %v266_v49 = vld [vmem:[#allocation8 + $0xc8] sm:$0xff]  ;;  %vm135_vm4 = vcmask 523648   ;;  %vm156_vm5 = vcmask 654848   ;;  %vm177_vm6 = vcmask 786048  }
  0x3e   :  { %v420_v46 = vpack.c.bf16 %v248_v42, %v247_v41  ;;  %v422_v50 = vpack.c.bf16 %v266_v49, %v265_v48  ;;  %v249_v51 = vld [vmem:[#allocation8 + $0x40] sm:$0xff]  ;;  %v250_v52 = vld [vmem:[#allocation8 + $0x48] sm:$0xff]  ;;  %v267_v59 = vld [vmem:[#allocation8 + $0xd0] sm:$0xff]  ;;  %vm198_vm7 = vcmask 917248   ;;  %vm219_vm8 = vcmask 1048448   ;;  %s607_s29 = smov [#allocation9]  }
  0x3f   :  { %447 = vmatpush3.bf16.msra.mxu1 %v412_v26  ;;  %413 = vmatpush3.bf16.msra.mxu0 %v412_v26  ;;  %v424_v54 = vpack.c.bf16 %v250_v52, %v249_v51  ;;  %v268_v60 = vld [vmem:[#allocation8 + $0xd8] sm:$0xff]  ;;  %v251_v62 = vld [vmem:[#allocation8 + $0x50] sm:$0xff]  ;;  %s355_s30 = sshll.u32 %s607_s29, 4  ;;  %s356_s30 = int_to_ptr.vmem [resolvable:$true] %s355_s30 }
  0x40   :  { %480 = vset.pattern.permute.xlu1 %v592_v4  ;;  %479 = vset.pattern.permute.xlu0 %v592_v4  ;;  %v426_v61 = vpack.c.bf16 %v268_v60, %v267_v59  ;;  %v252_v63 = vld [vmem:[#allocation8 + $0x58] sm:$0xff]  ;;  %v270_v4 = vld [vmem:[#allocation8 + $0xe8] sm:$0xff]  ;;  %v271_v12 = vld [vmem:[#allocation8 + $0xf0] sm:$0xff]  ;;  %s557_s4 = scalar_lea.vmem %s356_s30, 256  ;;  %p562_p11 = scmp.lt.s32.totalorder %s356_s30, %s356_s30 }
  0x41   :  { %122 = vperm.xlu1 %480, %v59_v3   ;;  %118 = vperm.xlu0 %479, %v58_v2   ;;  %v428_v0 = vpack.c.bf16 %v252_v63, %v251_v62  ;;  %v272_v13 = vld [vmem:[#allocation8 + $0xf8] sm:$0xff]  ;;  %v255_v14 = vld [vmem:[#allocation8 + $0x70] sm:$0xff]  ;;  %p558_p10 = scmp.ne.s32.totalorder %s356_s30, %s557_s4  ;;  %p563_p12 = scmp.lt.s32.totalorder %s557_s4, %s557_s4 }
  0x42   :  { %440 = vmatprep.subr.bf16.mxu1 %v414_v32  ;;  %415 = vmatprep.subr.bf16.mxu0 %v414_v32  ;;  %v434_v16 = vpack.c.bf16 %v272_v13, %v271_v12  ;;  %v256_v18 = vld [vmem:[#allocation8 + $0x78] sm:$0xff] }
  0x43   :  { %448 = vmatpush3.bf16.msra.mxu1 %v416_v37  ;;  %417 = vmatpush3.bf16.msra.mxu0 %v416_v37  ;;  %p564_p13 = por %p563_p12, %p562_p11 }
  0x44   :  { %441 = vmatprep.subr.bf16.mxu1 %v418_v40  ;;  %419 = vmatprep.subr.bf16.mxu0 %v418_v40 }
  0x45   :  { %481 = vset.pattern.permute.xlu1 %v593_v5  ;;  %482 = vset.pattern.permute.xlu0 %v593_v5  ;;  %p565_p0 = pnand %p564_p13, %p558_p10 }
  0x46   :  { %139 = vperm.xlu1 %481, %v58_v2   ;;  %143 = vperm.xlu0 %482, %v59_v3  }
  0x47   :  { %449 = vmatpush3.bf16.msra.mxu1 %v420_v46  ;;  %421 = vmatpush3.bf16.msra.mxu0 %v420_v46 }
  0x48   :  { %442 = vmatprep.subr.bf16.mxu1 %v422_v50  ;;  %423 = vmatprep.subr.bf16.mxu0 %v422_v50 }
  0x4a   :  { %483 = vset.pattern.permute.xlu1 %v594_v6  ;;  %484 = vset.pattern.permute.xlu0 %v595_v7 }
  0x4b   :  { %160 = vperm.xlu1 %483, %v58_v2   ;;  %181 = vperm.xlu0 %484, %v58_v2  }
  0x4c   :  { %450 = vmatpush3.bf16.msra.mxu1 %v424_v54  ;;  %425 = vmatpush3.bf16.msra.mxu0 %v424_v54 }
  0x4d   :  { %443 = vmatprep.subr.bf16.mxu1 %v426_v61  ;;  %427 = vmatprep.subr.bf16.mxu0 %v426_v61 }
  0x4f   :  { %164 = vperm.xlu1 %483, %v59_v3   ;;  %487 = vset.pattern.permute.xlu0 %v596_v8 }
  0x50   :  { %206 = vperm.xlu0 %487, %v59_v3   ;;  %451 = vmatpush3.bf16.msra.mxu1 %v428_v0 }
  0x51   :  { %429 = vmatpush3.bf16.msra.mxu0 %v428_v0 }
  0x53   :  { %485 = vset.pattern.permute.xlu1 %v595_v7  ;;  %v253_v7 = vld [vmem:[#allocation8 + $0x60] sm:$0xff] }
  0x54   :  { %185 = vperm.xlu1 %485, %v59_v3   ;;  %489 = vset.pattern.permute.xlu0 %v597_v9 }
  0x55   :  { %223 = vperm.xlu0 %489, %v58_v2  }
  0x58   :  { %486 = vset.pattern.permute.xlu1 %v596_v8  ;;  %v254_v8 = vld [vmem:[#allocation8 + $0x68] sm:$0xff] }
  0x59   :  { %202 = vperm.xlu1 %486, %v58_v2  }
  0x5d   :  { %488 = vset.pattern.permute.xlu1 %v598_v10 }
  0x5e   :  { %62 = vperm.xlu1 %488, %v58_v2  }
  0x62   :  { %67 = vperm.xlu1 %488, %v59_v3  }
  0x66   :  { %490 = vset.pattern.permute.xlu1 %v597_v9  ;;  %v432_v9 = vpack.c.bf16 %v254_v8, %v253_v7 }
  0x67   :  { %227 = vperm.xlu1 %490, %v59_v3   ;;  %v269_v3 = vld [vmem:[#allocation8 + $0xe0] sm:$0xff] }
  0x68   :  { %v430_v6 = vpack.c.bf16 %v270_v4, %v269_v3 }
  0x6a   :  { %444 = vmatprep.subr.bf16.mxu1 %v430_v6  ;;  %431 = vmatprep.subr.bf16.mxu0 %v430_v6 }
  0x6b   :  { %452 = vmatpush3.bf16.msra.mxu1 %v432_v9  ;;  %433 = vmatpush3.bf16.msra.mxu0 %v432_v9 }
  0x6c   :  { %445 = vmatprep.subr.bf16.mxu1 %v434_v16  ;;  %435 = vmatprep.subr.bf16.mxu0 %v434_v16 }
  0xb7   :  { %v98_v20 = vpop.permute.xlu1 %97  ;;  %v77_v21 = vpop.permute.xlu0 %76 }
  0xb8   :  { %v83_v25 = vmul.f32 %v77_v21, %v680_v17  ;;  %v104_v35 = vmul.f32 %v98_v20, %v680_v17  ;;  %v436_v20 = vpack.c.bf16 %v256_v18, %v255_v14 }
  0xba   :  { %87 = vrot.lane.b32.xlu1 %v83_v25, %s599_s2  ;;  %453 = vmatpush3.bf16.msra.mxu1 %v436_v20 }
  0xbb   :  { %v102_v30 = vpop.permute.xlu1 %101  ;;  %v81_v31 = vpop.permute.xlu0 %80  ;;  %437 = vmatpush3.bf16.msra.mxu0 %v436_v20 }
  0xbc   :  { %v84_v36 = vmul.f32 %v81_v31, %v683_v27  ;;  %v105_v43 = vmul.f32 %v102_v30, %v683_v27 }
  0xbe   :  { %89 = vrot.lane.b32.xlu0 %v84_v36, %s599_s2  ;;  %108 = vrot.lane.b32.xlu1 %v104_v35, %s600_s21 }
  0xc0   :  { %v123_v44 = vpop.permute.xlu1 %122  ;;  %v119_v45 = vpop.permute.xlu0 %118 }
  0xc1   :  { %v125_v47 = vmul.f32 %v119_v45, %v680_v17  ;;  %v126_v53 = vmul.f32 %v123_v44, %v683_v27 }
  0xc2   :  { %110 = vrot.lane.b32.xlu0 %v105_v43, %s600_s21 }
  0xc3   :  { %129 = vrot.lane.b32.xlu1 %v125_v47, %s601_s22 }
  0xc5   :  { %v140_v55 = vpop.permute.xlu1 %139  ;;  %v144_v56 = vpop.permute.xlu0 %143 }
  0xc6   :  { %v146_v57 = vmul.f32 %v140_v55, %v680_v17  ;;  %131 = vrot.lane.b32.xlu0 %v126_v53, %s601_s22  ;;  %v147_v58 = vmul.f32 %v144_v56, %v683_v27 }
  0xc8   :  { %150 = vrot.lane.b32.xlu1 %v146_v57, %s602_s23 }
  0xca   :  { %v161_v1 = vpop.permute.xlu1 %160  ;;  %152 = vrot.lane.b32.xlu0 %v147_v58, %s602_s23  ;;  %v182_v2 = vpop.permute.xlu0 %181 }
  0xcb   :  { %v167_v5 = vmul.f32 %v161_v1, %v680_v17  ;;  %v188_v10 = vmul.f32 %v182_v2, %v680_v17 }
  0xcd   :  { %171 = vrot.lane.b32.xlu1 %v167_v5, %s603_s26 }
  0xce   :  { %v165_v11 = vpop.permute.xlu1 %164 }
  0xcf   :  { %v168_v15 = vmul.f32 %v165_v11, %v683_v27  ;;  %v207_v19 = vpop.permute.xlu0 %206 }
  0xd0   :  { %v210_v25 = vmul.f32 %v207_v19, %v683_v27 }
  0xd1   :  { %173 = vrot.lane.b32.xlu0 %v168_v15, %s603_s26  ;;  %192 = vrot.lane.b32.xlu1 %v188_v10, %s604_s27 }
  0xd3   :  { %v186_v21 = vpop.permute.xlu1 %185 }
  0xd4   :  { %v189_v22 = vmul.f32 %v186_v21, %v683_v27  ;;  %v224_v23 = vpop.permute.xlu0 %223 }
  0xd5   :  { %v230_v24 = vmul.f32 %v224_v23, %v680_v17 }
  0xd6   :  { %194 = vrot.lane.b32.xlu0 %v189_v22, %s604_s27 }
  0xd7   :  { %232 = vst.msk [vmem:[#allocation2 + $0x8] sm:$0xff] %vm72_vm1, %v230_v24 }
  0xd8   :  { %v203_v26 = vpop.permute.xlu1 %202  ;;  %235 = vst.msk [vmem:[#allocation2 + $0x8] sm:$0xff] %vm234_vm0, %v605_v28 }
  0xd9   :  { %v209_v29 = vmul.f32 %v203_v26, %v680_v17 }
  0xda   :  { %215 = vrot.lane.b32.xlu0 %v210_v25, %s606_s28 }
  0xdb   :  { %213 = vrot.lane.b32.xlu1 %v209_v29, %s606_s28 }
  0xdd   :  { %v63_v30 = vpop.permute.xlu1 %62 }
  0xde   :  { %v70_v31 = vmul.f32 %v63_v30, %v680_v17 }
  0xdf   :  { %v238_v32 = vld [vmem:[#allocation2 + $0x8] sm:$0xff] }
  0xe0   :  { %73 = vst.msk [vmem:[#allocation2] sm:$0xff] %vm72_vm1, %v70_v31  ;;  %337 = vmatprep.mubr.f32.mxu0 %v238_v32 }
  0xe1   :  { %v68_v33 = vpop.permute.xlu1 %67 }
  0xe2   :  { %v71_v34 = vmul.f32 %v68_v33, %v683_v27 }
  0xe4   :  { %74 = vst.msk [vmem:[#allocation2 + $0x10] sm:$0xff] %vm72_vm1, %v71_v34 }
  0xe6   :  { %v228_v35 = vpop.permute.xlu1 %227 }
  0xe7   :  { %v231_v36 = vmul.f32 %v228_v35, %v683_v27 }
  0xe9   :  { %233 = vst.msk [vmem:[#allocation2 + $0x18] sm:$0xff] %vm72_vm1, %v231_v36 }
  0xea   :  { %236 = vst.msk [vmem:[#allocation2 + $0x18] sm:$0xff] %vm234_vm0, %v605_v28 }
  0xf1   :  { %v240_v37 = vld [vmem:[#allocation2 + $0x18] sm:$0xff] }
  0xf2   :  { %342 = vmatprep.mubr.f32.mxu1 %v240_v37 }
 0x12c   :  { %v88_v17 = vpop.permute.xlu1 %87 }
 0x12d   :  { %94 = vst.msk [vmem:[#allocation2] sm:$0xff] %vm93_vm2, %v88_v17 }
 0x130   :  { %v90_v38 = vpop.permute.xlu0 %89  ;;  %v109_v39 = vpop.permute.xlu1 %108 }
 0x131   :  { %95 = vst.msk [vmem:[#allocation2 + $0x10] sm:$0xff] %vm93_vm2, %v90_v38 }
 0x132   :  { %115 = vst.msk [vmem:[#allocation2] sm:$0xff] %vm114_vm3, %v109_v39 }
 0x134   :  { %v111_v40 = vpop.permute.xlu0 %110 }
 0x135   :  { %116 = vst.msk [vmem:[#allocation2 + $0x10] sm:$0xff] %vm114_vm3, %v111_v40  ;;  %v130_v41 = vpop.permute.xlu1 %129 }
 0x136   :  { %136 = vst.msk [vmem:[#allocation2] sm:$0xff] %vm135_vm4, %v130_v41 }
 0x138   :  { %v132_v27 = vpop.permute.xlu0 %131 }
 0x139   :  { %137 = vst.msk [vmem:[#allocation2 + $0x10] sm:$0xff] %vm135_vm4, %v132_v27 }
 0x13a   :  { %v151_v42 = vpop.permute.xlu1 %150 }
 0x13b   :  { %157 = vst.msk [vmem:[#allocation2] sm:$0xff] %vm156_vm5, %v151_v42 }
 0x13c   :  { %v153_v43 = vpop.permute.xlu0 %152 }
 0x13d   :  { %158 = vst.msk [vmem:[#allocation2 + $0x10] sm:$0xff] %vm156_vm5, %v153_v43 }
 0x13f   :  { %v172_v44 = vpop.permute.xlu1 %171 }
 0x140   :  { %178 = vst.msk [vmem:[#allocation2] sm:$0xff] %vm177_vm6, %v172_v44 }
 0x143   :  { %v174_v45 = vpop.permute.xlu0 %173  ;;  %v193_v46 = vpop.permute.xlu1 %192 }
 0x144   :  { %179 = vst.msk [vmem:[#allocation2 + $0x10] sm:$0xff] %vm177_vm6, %v174_v45 }
 0x145   :  { %199 = vst.msk [vmem:[#allocation2] sm:$0xff] %vm198_vm7, %v193_v46 }
 0x148   :  { %v195_v47 = vpop.permute.xlu0 %194 }
 0x149   :  { %200 = vst.msk [vmem:[#allocation2 + $0x10] sm:$0xff] %vm198_vm7, %v195_v47 }
 0x14c   :  { %v216_v48 = vpop.permute.xlu0 %215 }
 0x14d   :  { %221 = vst.msk [vmem:[#allocation2 + $0x10] sm:$0xff] %vm219_vm8, %v216_v48  ;;  %v214_v49 = vpop.permute.xlu1 %213 }
 0x14e   :  { %220 = vst.msk [vmem:[#allocation2] sm:$0xff] %vm219_vm8, %v214_v49 }
 0x154   :  { %v239_v50 = vld [vmem:[#allocation2 + $0x10] sm:$0xff] }
 0x155   :  { %343 = vmatmul.mubr.f32.vlgmr.msra.gmra.mrb[0].mxu1 %v239_v50  ;;  %v237_v51 = vld [vmem:[#allocation2] sm:$0xff] }
 0x156   :  { %338 = vmatmul.mubr.f32.vlgmr.msra.gmra.mrb[0].mxu0 %v237_v51 }
 0x228   :  { %v403_v52 = vpop.f32.mrb[0].mxu1 }
 0x229   :  { %v400_v53 = vpop.f32.mrb[0].mxu0  ;;  %v404_v54 = vpop.f32.mrb[1].mxu1 }
 0x22a   :  { %v405_v55 = vadd.f32 %v404_v54, %v403_v52  ;;  %v401_v56 = vpop.f32.mrb[1].mxu0 }
 0x22b   :  { %v402_v57 = vadd.f32 %v401_v56, %v400_v53 }
 0x22c   :  { %349 = vst [vmem:[#allocation9 + $0x8] sm:$0xff] %v405_v55 }
 0x22d   :  { %348 = vst [vmem:[#allocation9] sm:$0xff] %v402_v57 }
 0x22e   :  { %568 = shalt.err (!%p565_p0)
}
 0x22f   :  { %s569_s7 = scalar_lea.hbm %s726_s3, 256 }
 0x230   :  { %p570_p1 = scmp.ne.s32.totalorder %s726_s3, %s569_s7  ;;  %p573_p2 = scmp.lt.u32.totalorder %s569_s7, %s726_s3 }
 0x232   :  { %p575_p3 = pnand %p573_p2, %p570_p1 }
 0x234   :  { %578 = shalt.err (!%p575_p3)
}
 0x235   :  { %361 = dma.vmem_to_hbm [thread:$0]  %s356_s30, 256, %s726_s3, [#allocation5], %s587_s24, %s587_s24, %s588_s25  }
 0x236   :  { %583 = dma.done.wait [#allocation5], 256  }
 0x237   :  { %584 = vsyncadd [#allocation5], 4294967040 }
 0x238   :  { %365 = vsyncpa [#allocation4], 1 }
 0x239   :  { %366 = vsyncpa [#allocation7], 1 }
 0x23a   :  { %367 = vsyncpa [#allocation5], 1 }

</bundles_post_ra>
